<compile_context>
chip_gen: v7x
topology: tpu7x:2x2x1
jax: 0.10.0
libtpu: 0.0.40
codegen_flags: <defaults>
</compile_context>

<pallas_src>
import jax
import jax.numpy as jnp
from jax.experimental import pallas as pl
from jax.experimental.pallas import tpu as pltpu


def _spatial_attn_kernel(x_ref, w_ref, o_ref):
    # x_ref / o_ref: (1, C, TL) tiles -- channels on sublanes, spatial on lanes.
    # w_ref: (C, 1) f32 squeeze weights (tiny, resident across the whole grid).
    x = x_ref[0]                                                   # (C, TL)
    w = w_ref[...]                                                 # (C, 1) f32
    # z[l] = sum_c x[c, l] * w[c]  -- f32 accumulate (VPU multiply + XLU sublane reduce).
    z = jnp.sum(x.astype(jnp.float32) * w, axis=0, keepdims=True)  # (1, TL) f32
    gate = jax.nn.sigmoid(z)                                       # (1, TL) f32
    # Gate multiply in the input dtype (keeps bf16 narrow); broadcast over C sublanes.
    o_ref[0] = (x * gate.astype(x.dtype)).astype(o_ref.dtype)


def _choose_spatial_tile(hw, c, itemsize):
    # Largest lane tile (multiple of 128) whose double-buffered input+output
    # tiles stay under ~24 MiB -- safe on v7x's 64 MiB physical VMEM as well as
    # v5e/v6e.  Bigger tiles amortize the ~0.35 us per-grid-step overhead.
    budget = 24 * 1024 * 1024
    hw_128 = ((hw + 127) // 128) * 128
    tl = 128
    while tl * 2 <= hw_128 and 4 * c * (tl * 2) * itemsize <= budget:
        tl *= 2
    return tl


def spatial_attention_2d(x_nchw, weight):
    """x_nchw: (N, C, H, W); weight: (1, C, 1, 1) 1x1-conv weight (no bias)."""
    N, C, H, W = x_nchw.shape
    HW = H * W
    x3 = x_nchw.reshape(N, C, HW)                       # free reshape, no transpose
    w_col = weight.reshape(C, 1).astype(jnp.float32)    # channels on sublanes

    tl = _choose_spatial_tile(HW, C, x3.dtype.itemsize)
    hw_pad = ((HW + tl - 1) // tl) * tl                 # pad tail; keeps pipelining
    if hw_pad != HW:
        x3 = jnp.pad(x3, ((0, 0), (0, 0), (0, hw_pad - HW)))

    grid = (N, hw_pad // tl)

    out = pl.pallas_call(
        _spatial_attn_kernel,
        out_shape=jax.ShapeDtypeStruct((N, C, hw_pad), x3.dtype),
        grid_spec=pltpu.PrefetchScalarGridSpec(
            num_scalar_prefetch=0,
            grid=grid,
            in_specs=[
                pl.BlockSpec((1, C, tl), lambda n, s: (n, 0, s)),  # lane-dense tile
                pl.BlockSpec((C, 1), lambda n, s: (0, 0)),         # weights, resident
            ],
            out_specs=pl.BlockSpec((1, C, tl), lambda n, s: (n, 0, s)),
        ),
        compiler_params=pltpu.CompilerParams(
            dimension_semantics=("parallel", "parallel"),
            vmem_limit_bytes=48 * 1024 * 1024,
        ),
    )(x3, w_col)

    if hw_pad != HW:
        out = out[:, :, :HW]
    return out.reshape(N, C, H, W)


def _reference(x_nchw, weight):
    # Pure-JAX reference of the PyTorch forward.
    w = weight.reshape(1, -1, 1, 1)                     # (1, C, 1, 1)
    z = jnp.sum(x_nchw * w, axis=1, keepdims=True)      # (N, 1, H, W)
    return x_nchw * jax.nn.sigmoid(z)


if __name__ == "__main__":
    key = jax.random.PRNGKey(0)
    kx, kw = jax.random.split(key)

    # Main test case.
    N, C, H, W = 2, 4, 16, 16
    x = jax.random.normal(kx, (N, C, H, W), dtype=jnp.float32)
    weight = jax.random.normal(kw, (1, C, 1, 1), dtype=jnp.float32) * 0.1

    out = jax.block_until_ready(spatial_attention_2d(x, weight))
    ref = _reference(x, weight)
    assert out.shape == (N, C, H, W)
    assert jnp.allclose(out, ref, atol=1e-5, rtol=1e-5)

    # Non-128-aligned spatial extent exercises the padded-tail path
    # (replaces the old single full-array fallback block).
    N2, C2, H2, W2 = 2, 4, 10, 10
    x2 = jax.random.normal(kx, (N2, C2, H2, W2), dtype=jnp.float32)
    w2 = jax.random.normal(kw, (1, C2, 1, 1), dtype=jnp.float32) * 0.1
    out2 = jax.block_until_ready(spatial_attention_2d(x2, w2))
    assert jnp.allclose(out2, _reference(x2, w2), atol=1e-5, rtol=1e-5)

    print("KERNEL_OK")
</pallas_src>

<mosaic_0001>
module attributes {stable_mosaic.version = 11 : i64} {
  func.func @_spatial_attn_kernel(%arg0: i32, %arg1: i32, %arg2: memref<1x4x256xf32, #tpu.memory_space<vmem>>, %arg3: memref<4x1xf32, #tpu.memory_space<vmem>>, %arg4: memref<1x4x256xf32, #tpu.memory_space<vmem>>) attributes {dimension_semantics = [#tpu.dimension_semantics<parallel>, #tpu.dimension_semantics<parallel>], iteration_bounds = array<i64: 2, 1>, scalar_prefetch = 0 : i64, scratch_operands = 0 : i64, tpu.core_type = #tpu.core_type<tc>, window_params = [{transform_indices = @transform_0, window_bounds = array<i64: 1, 4, 256>}, {pipeline_mode = #tpu.pipeline_mode<synchronous>, transform_indices = @transform_1, window_bounds = array<i64: 4, 1>}, {transform_indices = @transform_2, window_bounds = array<i64: 1, 4, 256>}]} {
    %c0 = arith.constant 0 : index
    %c0_0 = arith.constant 0 : index
    %c0_1 = arith.constant 0 : index
    %0 = vector.load %arg2[%c0, %c0_0, %c0_1] : memref<1x4x256xf32, #tpu.memory_space<vmem>>, vector<1x4x256xf32>
    %1 = vector.shape_cast %0 : vector<1x4x256xf32> to vector<4x256xf32>
    %c0_2 = arith.constant 0 : index
    %c0_3 = arith.constant 0 : index
    %2 = vector.load %arg3[%c0_2, %c0_3] : memref<4x1xf32, #tpu.memory_space<vmem>>, vector<4x1xf32>
    %3 = vector.broadcast %2 : vector<4x1xf32> to vector<4x256xf32>
    %4 = arith.mulf %1, %3 : vector<4x256xf32>
    %cst = arith.constant dense<0.000000e+00> : vector<256xf32>
    %5 = vector.multi_reduction <add>, %4, %cst [0] : vector<4x256xf32> to vector<256xf32>
    %6 = vector.shape_cast %5 : vector<256xf32> to vector<1x256xf32>
    %7 = arith.negf %6 : vector<1x256xf32>
    %8 = math.exp %7 : vector<1x256xf32>
    %cst_4 = arith.constant 1.000000e+00 : f32
    %9 = vector.broadcast %cst_4 : f32 to vector<1x256xf32>
    %10 = arith.addf %9, %8 : vector<1x256xf32>
    %11 = arith.divf %9, %10 : vector<1x256xf32>
    %12 = vector.broadcast %11 : vector<1x256xf32> to vector<4x256xf32>
    %13 = arith.mulf %1, %12 : vector<4x256xf32>
    %c0_5 = arith.constant 0 : index
    %c0_6 = arith.constant 0 : index
    %c0_7 = arith.constant 0 : index
    %14 = vector.load %arg4[%c0_5, %c0_6, %c0_7] : memref<1x4x256xf32, #tpu.memory_space<vmem>>, vector<1x4x256xf32>
    %15 = vector.shape_cast %14 : vector<1x4x256xf32> to vector<4x256xf32>
    %16 = vector.shape_cast %13 : vector<4x256xf32> to vector<1x4x256xf32>
    tpu.vector_store %arg4[%c0_5, %c0_6, %c0_7], %16 {strides = array<i32>} : memref<1x4x256xf32, #tpu.memory_space<vmem>>, vector<1x4x256xf32>,
    return
  }
  func.func @transform_0(%arg0: i32, %arg1: i32) -> (i32, i32, i32) {
    %c0_i32 = arith.constant 0 : i32
    %c0_i32_0 = arith.constant 0 : i32
    return %arg0, %c0_i32, %arg1 : i32, i32, i32
  }
  func.func @transform_1(%arg0: i32, %arg1: i32) -> (i32, i32) {
    %c0_i32 = arith.constant 0 : i32
    %c0_i32_0 = arith.constant 0 : i32
    %c0_i32_1 = arith.constant 0 : i32
    return %c0_i32, %c0_i32_0 : i32, i32
  }
  func.func @transform_2(%arg0: i32, %arg1: i32) -> (i32, i32, i32) {
    %c0_i32 = arith.constant 0 : i32
    %c0_i32_0 = arith.constant 0 : i32
    return %arg0, %c0_i32, %arg1 : i32, i32, i32
  }
}

</mosaic_0001>

<bundles_post_ra>
// kernel: tpu_custom_call.1
= control target key start
LH: loop header
LB: loop body
LE: loop exit
PB: predicated region body
PF: predicated region fallthrough
CT: control target
= control target key end

     0   :  { %7 = vsyncpa [#allocation3], 0  ;;  %s736_s0 = inlined_call_operand.hbm [shape: f32[2,4,256], index: 0, kind: input, shape index: {}]   ;;  %s737_s1 = inlined_call_operand.vmem [shape: f32[4,1], index: 1, kind: input, shape index: {}]   ;;  %s738_s2 = inlined_call_operand.hbm [shape: f32[2,4,256], index: 2, kind: output, shape index: {}]  }
   0x1   :  { %9 = vsyncpa [#allocation3 + $0x1], 0 }
   0x2   :  { %10 = vsyncpa [#allocation4], 0 }
   0x3   :  { %12 = vsyncpa [#allocation4 + $0x1], 0  ;;  %s557_s9 = smov 0   ;;  %s559_s10 = smov 0  }
   0x4   :  { %s561_s11 = smov 0   ;;  %s563_s12 = smov 0  }
   0x5   :  { %s565_s13 = smov 0   ;;  %s567_s14 = smov 0  }
   0x6 LB: > { %s332_s15 = sadd.s32 4294967295, %s536_s14   ;;  %s333_s16 = sadd.s32 4294967294, %s536_s14   ;;  %s536_s14 = sphi %s567_s14, %s18_s14   ;;  %s532_s13 = sphi %s565_s13, %s754_s13   ;;  %s528_s12 = sphi %s563_s12, %s753_s12   ;;  %s524_s11 = sphi %s561_s11, %s752_s11   ;;  %s520_s10 = sphi %s559_s10, %s751_s10   ;;  %s516_s9 = sphi %s557_s9, %s750_s9  }
   0x7   : > { %s30_s17 = sadd.s32 1, %s532_s13  ;;  %s39_s18 = sadd.s32 1, %s524_s11 }
   0x8   : > { %p32_p0 = scmp.ge.s32.totalorder %s30_s17, 2  ;;  %p46_p1 = scmp.ne.s32.totalorder %s524_s11, %s520_s10 }
   0x9   : > { %p47_p2 = scmp.eq.s32.totalorder %s536_s14, 0  ;;  %p52_p3 = scmp.ne.s32.totalorder %s520_s10, %s516_s9 }
   0xa   : > { %s756_s17 = smov (%p32_p0, %s30_s17), 0  ;;  %p53_p5 = scmp.eq.s32.totalorder %s332_s15, 0 }
   0xb   : > { %p598_p4 = por %p47_p2, %p46_p1  ;;  %s34_s20 = ssub.s32 %s532_s13, %s756_s17 }
   0xc   : > { %p99_p6 = scmp.eq.s32.totalorder %s332_s15, 1  ;;  %p37_p7 = scmp.eq.s32.totalorder %s34_s20, 0 }
   0xd   : > { %p604_p8 = por %p53_p5, %p52_p3  ;;  %p105_p10 = scmp.eq.s32.totalorder %s333_s16, 1 }
   0xe   : > { %p608_p9 = por %p99_p6, %p46_p1  ;;  %p363_p13 = scmp.lt.s32.totalorder %s536_s14, 2 }
   0xf   : > { %s613_s23 = scalar_select %p37_p7, %s524_s11, %s39_s18  }
  0x10   : > { %s742_s22 = scalar_select %p608_p9, 1, 0 }
  0x11   : > { %p615_p11 = por %p105_p10, %p52_p3  ;;  %s128_s25 = sand.u32 1, %s524_s11  }
  0x12   : > { %s336_s26 = sshll.u32 %s128_s25, 3  ;;  %s349_s27 = sshll.u32 %s532_s13, 7 }
  0x13   : > { %s743_s24 = scalar_select %p615_p11, 1, 0 }
  0x14   : > { %s626_s30 = scalar_lea.hbm %s736_s0, %s349_s27  ;;  %s132_s3 = scalar_lea.vmem [#allocation2], %s336_s26 }
  0x15   : > { %s142_s4 = sshll.u32 %s132_s3, 4  ;;  %p632_p0 = pnand %p363_p13, %p598_p4  ;;  %s628_s4 = int_to_ptr.vmem [resolvable:$true] %s142_s4 }
  0x16   : > { %s129_s6 = scalar_lea.sflag [#allocation3], %s128_s25  ;;  %s424_s7 = scalar_lea.hbm %s626_s30, 128 }
  0x17   : > { %p425_p3 = scmp.ne.s32.totalorder %s626_s30, %s424_s7  ;;  %p426_p5 = pneg %p632_p0 }
  0x18   : > { %s429_s16 = scalar_lea.hbm %s736_s0, 256  ;;  %p430_p4 = scmp.lt.u32.totalorder %s626_s30, %s736_s0 }
  0x19   : > { %p427_p6 = pnand %p426_p5, %p425_p3  ;;  %p431_p10 = scmp.lt.u32.totalorder %s429_s16, %s424_s7 }
  0x1a   : > { %p433_p12 = scmp.lt.u32.totalorder %s424_s7, %s626_s30 }
  0x1b   : > { %p428_p7 = pneg %p427_p6  ;;  %p432_p13 = por %p431_p10, %p430_p4 }
  0x1d   : > { %p434_p1 = por %p433_p12, %p432_p13 }
  0x1f   : > { %p435_p2 = pnand %p434_p1, %p428_p7 }
  0x21   : > { %438 = shalt.err (!%p435_p2)
}
  0x22   : > { %s439_s20 = scalar_lea.vmem %s628_s4, 128  ;;  %s538_s25 = smov [#allocation2]  }
  0x23   : > { %p440_p3 = scmp.ne.s32.totalorder %s628_s4, %s439_s20  ;;  %s444_s26 = sshll.u32 %s538_s25, 4  ;;  %s445_s26 = int_to_ptr.vmem [resolvable:$false] %s444_s26 }
  0x24   : > { %s446_s27 = scalar_lea.vmem %s445_s26, 256  ;;  %p447_p9 = scmp.lt.s32.totalorder %s628_s4, %s445_s26 }
  0x25   : > { %p442_p6 = pnand %p440_p3, %p426_p5  ;;  %p448_p4 = scmp.lt.s32.totalorder %s446_s27, %s439_s20 }
  0x27   : > { %p443_p11 = pneg %p442_p6  ;;  %p449_p10 = por %p448_p4, %p447_p9 }
  0x29   : > { %p450_p12 = pnand %p449_p10, %p443_p11 }
  0x2b   : > { %453 = shalt.err (!%p450_p12)
}
  0x2c   : > { %358 = dma.hbm_to_vmem [thread:$0]  (!%p632_p0), %s626_s30, 128, %s628_s4, %s129_s6  }
  0x2d   : > { %p745_p1 = scmp.lt.s32.totalorder %s536_s14, 3  ;;  %p746_p2 = scmp.ge.s32.totalorder %s536_s14, 1 }
  0x2f   : > { %p148_p5 = pnand %p746_p2, %p745_p1 }
  0x30   : > { %s668_s28 = sand.u32 (!%p148_p5), 1, %s520_s10  }
  0x31   : > { %151 = sbr.rel (%p148_p5) target bundleno = 250 (0xfa), region = 28  ;;  %s340_s29 = sshll.u32 (!%p148_p5), %s668_s28, 3 }
  0x32   : > { %s154_s3 = scalar_lea.sflag (!%p148_p5), [#allocation3], %s668_s28  ;;  %s157_s5 = scalar_lea.vmem (!%p148_p5), [#allocation2], %s340_s29 }
  0x38   : > { %507 = dma.done.wait (%p604_p8), %s154_s3, 128  }
  0x39   : > { %509 = vsyncadd (%p604_p8), %s154_s3, 4294967168  ;;  %v539_v0 = vmov 0   ;;  %v181_v1 = vld [vmem:[%s737_s1] sm:$0xf]  ;;  %v540_v2 = vmov 839922192   ;;  %v189_v4 = vlaneseq }
  0x3a   : > { %415 = vset.pattern.permute.xlu0 %v539_v0  ;;  %v187_v3 = vunpack.c.l.s4 %v540_v2  ;;  %v180_v9 = vld [vmem:[%s157_s5] sm:$0xff]  ;;  %vm198_vm0 = vcmask 1043456   ;;  %s350_s21 = sshll.u32 %s528_s12, 7  ;;  %s177_s6 = scalar_lea.vmem [#allocation5], %s340_s29 }
  0x3b   : > { %184 = vperm.xlu0 %415, %v181_v1   ;;  %v190_v6 = vshrl.u32 %v189_v4, 7  ;;  %s248_s7 = sshll.u32 %s177_s6, 4  ;;  %s687_s16 = scalar_lea.hbm %s738_s2, %s350_s21  ;;  %s689_s7 = int_to_ptr.vmem [resolvable:$true] %s248_s7 }
  0x3c   : > { %v188_v5 = vunpack.c.0.s8 %v187_v3  ;;  %s232_s18 = scalar_lea.sflag [#allocation4], %s668_s28  ;;  %s454_s19 = scalar_lea.vmem %s689_s7, 128 }
  0x3d   : > { %p455_p8 = scmp.ne.s32.totalorder %s689_s7, %s454_s19  ;;  %p747_p9 = scmp.ne.s32.totalorder %s742_s22, 0 }
  0x3e   : > { %v191_v7 = vsub.s32 %v188_v5, %v190_v6  ;;  %s541_s12 = smov [#allocation5]  }
  0x3f   : > { %p456_p11 = pnand %p455_p8, %p747_p9  ;;  %s458_s20 = sshll.u32 %s541_s12, 4  ;;  %s459_s20 = int_to_ptr.vmem [resolvable:$false] %s458_s20 }
  0x40   : > { %s460_s25 = scalar_lea.vmem %s459_s20, 256  ;;  %p461_p7 = scmp.lt.s32.totalorder %s689_s7, %s459_s20 }
  0x41   : > { %p457_p0 = pneg %p456_p11  ;;  %p462_p13 = scmp.lt.s32.totalorder %s460_s25, %s454_s19 }
  0x43   : > { %p463_p3 = por %p462_p13, %p461_p7 }
  0x45   : > { %p464_p6 = pnand %p463_p3, %p457_p0 }
  0xba   : > { %v185_v8 = vpop.permute.xlu0 %184 }
  0xbb   : > { %v192_v10 = vrot.slane %v185_v8, %v191_v7 }
  0xbd   : > { %v194_v11 = vmul.f32 %v192_v10, %v180_v9 }
  0xbf   : > { %v196_v12 = vcombine.high %v194_v11, %v194_v11  ;;  %v199_v13 = vsel %vm198_vm0, %v194_v11, 0.0 }
  0xc0   : > { %v200_v14 = vrot.slane %v199_v13, 4 }
  0xc1   : > { %v206_v15 = vsel %vm198_vm0, %v196_v12, 0.0 }
  0xc2   : > { %v201_v16 = vadd.f32 %v200_v14, %v199_v13  ;;  %v207_v17 = vrot.slane %v206_v15, 4 }
  0xc4   : > { %v202_v18 = vrot.slane %v201_v16, 2  ;;  %v208_v19 = vadd.f32 %v207_v17, %v206_v15 }
  0xc6   : > { %v203_v20 = vadd.f32 %v202_v18, %v201_v16  ;;  %v209_v21 = vrot.slane %v208_v19, 2 }
  0xc8   : > { %v204_v22 = vrot.slane %v203_v20, 1  ;;  %v210_v23 = vadd.f32 %v209_v21, %v208_v19 }
  0xca   : > { %v205_v24 = vadd.f32 %v204_v22, %v203_v20  ;;  %v211_v25 = vrot.slane %v210_v23, 1 }
  0xcc   : > { %v212_v26 = vadd.f32 %v211_v25, %v210_v23  ;;  %v342_v27 = vmul.f32 -1.442695, %v205_v24 }
  0xce   : > { %416 = vpow2.f32 %v342_v27  ;;  %v343_v28 = vmul.f32 -1.442695, %v212_v26 }
  0xd0   : > { %418 = vpow2.f32 %v343_v28 }
  0xd8   : > { %v417_v29 = vpop.eup %416 }
  0xd9   : > { %v219_v30 = vadd.f32 1.0, %v417_v29 }
  0xda   : > { %v419_v31 = vpop.eup %418 }
  0xdb   : > { %v220_v32 = vadd.f32 1.0, %v419_v31  ;;  %420 = vrcp.f32 %v219_v30 }
  0xdd   : > { %422 = vrcp.f32 %v220_v32 }
  0xe5   : > { %v421_v33 = vpop.eup %420 }
  0xe7   : > { %v423_v34 = vpop.eup %422 }
  0xe8   : > { %v227_v35 = vcombine.low %v421_v33, %v423_v34 }
  0xea   : > { %v229_v36 = vmul.f32 %v227_v35, %v180_v9 }
  0xec   : > { %230 = vst [vmem:[%s177_s6] sm:$0xff] %v229_v36 }
  0xed   : > { %467 = shalt.err (!%p464_p6)
}
  0xee   : > { %s468_s26 = scalar_lea.hbm %s687_s16, 128  ;;  %s472_s29 = scalar_lea.hbm %s738_s2, 256 }
  0xef   : > { %p469_p4 = scmp.ne.s32.totalorder %s687_s16, %s468_s26  ;;  %p473_p1 = scmp.lt.u32.totalorder %s687_s16, %s738_s2 }
  0xf0   : > { %p474_p2 = scmp.lt.u32.totalorder %s472_s29, %s468_s26  ;;  %p476_p8 = scmp.lt.u32.totalorder %s468_s26, %s687_s16 }
  0xf1   : > { %p470_p10 = pnand %p469_p4, %p747_p9 }
  0xf2   : > { %p475_p5 = por %p474_p2, %p473_p1 }
  0xf3   : > { %p471_p12 = pneg %p470_p10 }
  0xf4   : > { %p477_p11 = por %p476_p8, %p475_p5 }
  0xf6   : > { %p478_p0 = pnand %p477_p11, %p471_p12 }
  0xf8   : > { %481 = shalt.err (!%p478_p0)
}
  0xf9   : > { %353 = dma.vmem_to_hbm [thread:$0]  (%p747_p9), %s689_s7, 128, %s687_s16, %s232_s18  }
  0xfa PF: > { %s260_s30 = sand.u32 1, %s516_s9   ;;  %p748_p7 = scmp.ne.s32.totalorder %s743_s24, 0 }
  0xfb   : > { %p749_p13 = scmp.ge.s32.totalorder %s536_s14, 2  ;;  %s261_s4 = scalar_lea.sflag [#allocation4], %s260_s30 }
  0xfd   : > { %p360_p3 = pnand %p749_p13, %p748_p7 }
  0xff   : > { %511 = dma.done.wait (!%p360_p3), %s261_s4, 128  }
 0x100   : > { %513 = vsyncadd (!%p360_p3), %s261_s4, 4294967168  ;;  %s18_s14 = sadd.s32 1, %s536_s14   ;;  %s750_s9 = smov %s520_s10 }
 0x101   : > { %p15_p6 = scmp.ge.s32.totalorder %s18_s14, 4   ;;  %s751_s10 = smov %s524_s11 }
 0x102   : > { %s752_s11 = smov %s613_s23  ;;  %s753_s12 = smov %s532_s13 }
 0x103   : > { %s754_s13 = smov %s756_s17  ;;  %17 = sbr.rel (!%p15_p6) target bundleno = 6 (0x6), region = 73 }
 0x10a   :  { %266 = vsyncpa [#allocation3], 1 }
 0x10b   :  { %268 = vsyncpa [#allocation3 + $0x1], 1 }
 0x10c   :  { %269 = vsyncpa [#allocation4], 1 }
 0x10d   :  { %271 = vsyncpa [#allocation4 + $0x1], 1 }

</bundles_post_ra>
